<compile_context>
chip_gen: v7x
topology: tpu7x:2x2x1
jax: 0.10.0
libtpu: 0.0.40
codegen_flags: <defaults>
</compile_context>

<pallas_src>
import jax
import jax.numpy as jnp
from jax.experimental import pallas as pl
from jax.experimental.pallas import tpu as pltpu

_MiB = 1024 * 1024

# "A @ B.T": contract the last dim of both operands (NT form for the MXU).
_NT_DIMS = (((1,), (1,)), ((), ()))


def _round_hidden(hidden_dim: int, multiple_of: int, ffn_dim_multiplier):
    hidden_dim = int(2 * hidden_dim / 3)
    if ffn_dim_multiplier is not None:
        hidden_dim = int(ffn_dim_multiplier * hidden_dim)
    return multiple_of * ((hidden_dim + multiple_of - 1) // multiple_of)


def _round_up(n, m):
    return ((n + m - 1) // m) * m


def _chip_gen() -> int:
    """TPU generation (5/6/7); falls back to 6 if undetectable."""
    try:
        kind = jax.devices()[0].device_kind.lower()
    except Exception:
        return 6
    for g in (7, 6, 5, 4):
        if f"v{g}" in kind:
            return g
    return 6


def _physical_vmem_bytes(gen: int) -> int:
    try:
        info = pltpu.get_tpu_info()
        cap = int(getattr(info, "vmem_capacity_bytes", 0) or 0)
        if cap > 0:
            return cap
    except Exception:
        pass
    return (64 if gen >= 7 else 128) * _MiB


def _vmem_budget_bytes(gen: int) -> int:
    # Leave ~8 MiB headroom for compiler-internal scratch; never ask for more
    # than ~104 MiB even on 128 MiB chips.
    return min(_physical_vmem_bytes(gen) - 8 * _MiB, 104 * _MiB)


def _chip_tile_targets(gen: int):
    # (tm_target, th_target, align). tm must exceed peak_flops/HBM_BW to be
    # MXU-bound on weight streaming: ~240 (v5e), ~720 (v6e), ~310 (v7x).
    if gen <= 5:
        return 512, 1024, 128      # 4x128 MXU -> 128 alignment is enough
    if gen == 6:
        return 1024, 1024, 256     # 128 MiB VMEM, 2x256 MXU
    return 512, 512, 256           # v7x: 64 MiB VMEM -> smaller tiles


def _pick_hidden_tile(hidden: int, target: int, align: int) -> int:
    """Largest divisor of `hidden` <= target that is a multiple of `align`
    (falls back to 128-aligned, then the full extent)."""
    if hidden <= 128:
        return hidden
    for a in sorted({align, 128}, reverse=True):
        d = (min(target, hidden) // a) * a
        while d >= a:
            if hidden % d == 0:
                return d
            d -= a
    return hidden


def _vmem_estimate(tm: int, th: int, dim: int, itemsize: int) -> int:
    """Double-buffered pipeline tiles + accumulator + f32 intermediates."""
    x_b = 2 * tm * dim * itemsize            # x tile (2 pipeline buffers)
    w13_b = 2 * (2 * th) * dim * itemsize    # fused [w1;w3] tile
    w2_b = 2 * dim * th * itemsize           # w2 tile
    out_b = 2 * tm * dim * itemsize          # output tile
    acc_b = tm * dim * 4                     # f32 accumulator scratch
    interm = tm * th * (2 * 4 + 4 + 2)       # h13 f32 + gated h f32 + bf16 cast
    return x_b + w13_b + w2_b + out_b + acc_b + interm


def _fit_to_budget(tm, th, dim, hidden, itemsize, budget, align):
    """Shrink th first (tm = arithmetic intensity), then tm, until it fits."""
    while _vmem_estimate(tm, th, dim, itemsize) > budget:
        if th > 128:
            nxt = _pick_hidden_tile(hidden, target=th - 128, align=align)
            if 0 < nxt < th:
                th = nxt
                continue
        if tm > 256:
            tm = max(256, _round_up(tm // 2, align))
            continue
        if tm > 16:
            tm = max(16, _round_up(tm // 2, 16))
            continue
        break
    return tm, th


def _make_ffn_kernel(th: int):
    def _ffn_kernel(x_ref, w13_ref, w2_ref, o_ref, acc_ref):
        # x_ref   : (tm, dim)    bf16 activations (resident across hidden loop)
        # w13_ref : (2*th, dim)  [w1 tile ; w3 tile] interleaved per hidden tile
        # w2_ref  : (dim, th)    w2 tile (PyTorch layout)
        # o_ref   : (tm, dim)    output tile
        # acc_ref : (tm, dim)    f32 accumulator scratch
        k = pl.program_id(1)

        @pl.when(k == 0)
        def _():
            acc_ref[...] = jnp.zeros_like(acc_ref)

        x = x_ref[...]
        # One fused MXU pass: (tm, dim) x (2*th, dim)^T -> (tm, 2*th), f32 acc.
        h13 = jax.lax.dot_general(x, w13_ref[...], _NT_DIMS,
                                  preferred_element_type=jnp.float32)
        h1 = h13[:, :th]          # x @ w1_tile.T
        h3 = h13[:, th:]          # x @ w3_tile.T
        # SiLU gate in f32 (VPU + EUP), back to bf16 for the second MXU pass.
        h = (h1 * jax.nn.sigmoid(h1)) * h3
        # Partial contraction over this hidden tile: acc += h @ w2_tile.T.
        acc_ref[...] += jax.lax.dot_general(h.astype(w2_ref.dtype), w2_ref[...],
                                            _NT_DIMS,
                                            preferred_element_type=jnp.float32)

        @pl.when(k == pl.num_programs(1) - 1)
        def _():
            o_ref[...] = acc_ref[...].astype(o_ref.dtype)

    return _ffn_kernel


def feed_forward(x, w1, w2, w3, *, tm=None, th=None, compute_dtype=jnp.bfloat16):
    """SwiGLU MLP: w2( silu(w1(x)) * w3(x) ).

    x : (T, dim);  w1, w3 : (hidden, dim);  w2 : (dim, hidden)  (PyTorch layout).
    """
    T, dim = x.shape
    hidden = w1.shape[0]
    assert w1.shape == (hidden, dim)
    assert w3.shape == (hidden, dim)
    assert w2.shape == (dim, hidden)

    gen = _chip_gen()
    itemsize = jnp.dtype(compute_dtype).itemsize
    budget = _vmem_budget_bytes(gen)
    tm_target, th_target, align = _chip_tile_targets(gen)

    auto = tm is None and th is None
    if tm is None:
        tm = (min(tm_target, _round_up(T, align)) if T >= align
              else _round_up(max(T, 1), 16))
    if th is None:
        th = _pick_hidden_tile(hidden, target=th_target, align=align)
    if auto:
        tm, th = _fit_to_budget(tm, th, dim, hidden, itemsize, budget, align)
    assert hidden % th == 0, "hidden tile must divide the hidden dimension"
    n_k = hidden // th

    xc = x.astype(compute_dtype)
    w1c = w1.astype(compute_dtype)
    w3c = w3.astype(compute_dtype)
    w2c = w2.astype(compute_dtype)

    # Fused gate/up weight: per hidden tile k, rows [2*k*th, 2*(k+1)*th) hold
    # the w1 tile followed by the w3 tile, so a single BlockSpec (and a single
    # MXU pass per step) covers both projections.
    # TODO(synk): in a real model pre-stack this once at weight-load time
    # instead of per call.
    w13 = jnp.concatenate(
        [w1c.reshape(n_k, th, dim), w3c.reshape(n_k, th, dim)], axis=1
    ).reshape(2 * hidden, dim)

    # Pad the token axis so the grid is rectangular; padded rows are zeros and
    # are sliced off afterwards (zeros flow to zeros through the MLP).
    T_pad = _round_up(T, tm)
    if T_pad != T:
        xc = jnp.pad(xc, ((0, T_pad - T), (0, 0)))

    grid = (T_pad // tm, n_k)
    # TODO(synk): for v7x decode (single token tile) split the hidden reduction
    # across the two TensorCores (core_map / CORE_PARALLEL) so weight streaming
    # uses full-chip HBM bandwidth.

    # Scoped VMEM: always set explicitly (v5e's default is only 16 MiB), with
    # the f32 intermediates included in the estimate and chip-aware headroom.
    est = _vmem_estimate(tm, th, dim, itemsize)
    vmem_limit = min(budget, _round_up(max(int(est * 1.3), 32 * _MiB), _MiB))
    vmem_limit = max(vmem_limit, _round_up(est, _MiB))

    out_itemsize = jnp.dtype(x.dtype).itemsize
    cost = pl.CostEstimate(
        flops=6 * T_pad * dim * hidden,
        transcendentals=T_pad * hidden,
        bytes_accessed=(T_pad * dim * (itemsize + out_itemsize)
                        + (T_pad // tm) * 3 * hidden * dim * itemsize),
    )

    out = pl.pallas_call(
        _make_ffn_kernel(th),
        out_shape=jax.ShapeDtypeStruct((T_pad, dim), x.dtype),
        grid_spec=pltpu.PrefetchScalarGridSpec(
            num_scalar_prefetch=0,
            grid=grid,
            in_specs=[
                # x tile: constant in k -> resident across the hidden loop.
                pl.BlockSpec((tm, dim), lambda i, k: (i, 0)),
                # Fused [w1;w3] tile and w2 tile streamed along the hidden axis.
                pl.BlockSpec((2 * th, dim), lambda i, k: (k, 0)),
                pl.BlockSpec((dim, th), lambda i, k: (0, k)),
            ],
            out_specs=pl.BlockSpec((tm, dim), lambda i, k: (i, 0)),
            scratch_shapes=[pltpu.VMEM((tm, dim), jnp.float32)],
        ),
        compiler_params=pltpu.CompilerParams(
            dimension_semantics=("parallel", "arbitrary"),
            vmem_limit_bytes=int(vmem_limit),
        ),
        cost_estimate=cost,
    )(xc, w13, w2c)

    if T_pad != T:
        out = out[:T]
    return out


if __name__ == "__main__":
    # Small config: dim=128, hidden_dim=256, multiple_of=128, no multiplier -> hidden=256
    dim = 128
    hidden = _round_hidden(256, 128, None)          # 256
    num_tokens = 256

    key = jax.random.PRNGKey(0)
    kx, k1, k2, k3 = jax.random.split(key, 4)

    # bf16 activations (matches the module's get_input default) and bf16 weights.
    x = jax.random.normal(kx, (num_tokens, dim), dtype=jnp.float32).astype(jnp.bfloat16)
    w1 = (0.02 * jax.random.normal(k1, (hidden, dim))).astype(jnp.bfloat16)
    w2 = (0.02 * jax.random.normal(k2, (dim, hidden))).astype(jnp.bfloat16)
    w3 = (0.02 * jax.random.normal(k3, (hidden, dim))).astype(jnp.bfloat16)

    # Pure-JAX f32 reference (bf16 inputs are exact in f32).
    xf = x.astype(jnp.float32)
    w1f, w2f, w3f = (w.astype(jnp.float32) for w in (w1, w2, w3))
    h1 = xf @ w1f.T
    ref = ((h1 * jax.nn.sigmoid(h1)) * (xf @ w3f.T)) @ w2f.T

    # (1) explicit small tiles -> 2x2 grid: exercises the parallel token axis,
    #     the hidden-reduction accumulator and the fused w1/w3 interleave.
    out_tiled = jax.block_until_ready(feed_forward(x, w1, w2, w3, tm=128, th=128))
    # (2) chip-aware auto tiles (single-tile grid at these small shapes).
    out_auto = jax.block_until_ready(feed_forward(x, w1, w2, w3))

    for out in (out_tiled, out_auto):
        assert out.shape == (num_tokens, dim)
        err = float(jnp.max(jnp.abs(out.astype(jnp.float32) - ref)))
        assert jnp.allclose(out.astype(jnp.float32), ref, atol=2e-3, rtol=2e-2), err

    print("KERNEL_OK")
</pallas_src>

<mosaic_0001>
module attributes {stable_mosaic.version = 11 : i64} {
  func.func @_ffn_kernel(%arg0: i32, %arg1: i32, %arg2: memref<128x128xbf16, #tpu.memory_space<vmem>>, %arg3: memref<256x128xbf16, #tpu.memory_space<vmem>>, %arg4: memref<128x128xbf16, #tpu.memory_space<vmem>>, %arg5: memref<128x128xbf16, #tpu.memory_space<vmem>>, %arg6: memref<128x128xf32, #tpu.memory_space<vmem>>) attributes {dimension_semantics = [#tpu.dimension_semantics<parallel>, #tpu.dimension_semantics<arbitrary>], iteration_bounds = array<i64: 2, 2>, scalar_prefetch = 0 : i64, scratch_operands = 1 : i64, tpu.core_type = #tpu.core_type<tc>, window_params = [{transform_indices = @transform_0, window_bounds = array<i64: 128, 128>}, {transform_indices = @transform_1, window_bounds = array<i64: 256, 128>}, {transform_indices = @transform_2, window_bounds = array<i64: 128, 128>}, {transform_indices = @transform_3, window_bounds = array<i64: 128, 128>}]} {
    %c0_i32 = arith.constant 0 : i32
    %0 = arith.cmpi eq, %arg1, %c0_i32 : i32
    %1 = arith.extui %0 : i1 to i32
    %c0_i32_0 = arith.constant 0 : i32
    %2 = arith.cmpi ne, %1, %c0_i32_0 : i32
    scf.if %2 {
      %cst_13 = arith.constant 0.000000e+00 : f32
      %24 = vector.broadcast %cst_13 : f32 to vector<128x128xf32>
      %c0_14 = arith.constant 0 : index
      %c0_15 = arith.constant 0 : index
      %25 = vector.load %arg6[%c0_14, %c0_15] : memref<128x128xf32, #tpu.memory_space<vmem>>, vector<128x128xf32>
      tpu.vector_store %arg6[%c0_14, %c0_15], %24 {strides = array<i32>} : memref<128x128xf32, #tpu.memory_space<vmem>>, vector<128x128xf32>,
    } else {
    }
    %c0 = arith.constant 0 : index
    %c0_1 = arith.constant 0 : index
    %3 = vector.load %arg2[%c0, %c0_1] : memref<128x128xbf16, #tpu.memory_space<vmem>>, vector<128x128xbf16>
    %c0_2 = arith.constant 0 : index
    %c0_3 = arith.constant 0 : index
    %4 = vector.load %arg3[%c0_2, %c0_3] : memref<256x128xbf16, #tpu.memory_space<vmem>>, vector<256x128xbf16>
    %cst = arith.constant dense<0.000000e+00> : vector<128x256xf32>
    %5 = tpu.matmul %3, %4, %cst {dimension_numbers = #tpu.dot_dimension_numbers<[1], [1], [0], [0], [0, 0, 1, 0], [], []>} : vector<128x128xbf16>, vector<256x128xbf16>, vector<128x256xf32> -> vector<128x256xf32>
    %6 = vector.extract_strided_slice %5 {offsets = [0, 0], sizes = [128, 128], strides = [1, 1]} : vector<128x256xf32> to vector<128x128xf32>
    %7 = vector.extract_strided_slice %5 {offsets = [0, 128], sizes = [128, 128], strides = [1, 1]} : vector<128x256xf32> to vector<128x128xf32>
    %8 = arith.negf %6 : vector<128x128xf32>
    %9 = math.exp %8 : vector<128x128xf32>
    %cst_4 = arith.constant 1.000000e+00 : f32
    %10 = vector.broadcast %cst_4 : f32 to vector<128x128xf32>
    %11 = arith.addf %10, %9 : vector<128x128xf32>
    %12 = arith.divf %10, %11 : vector<128x128xf32>
    %13 = arith.mulf %6, %12 : vector<128x128xf32>
    %14 = arith.mulf %13, %7 : vector<128x128xf32>
    %c0_5 = arith.constant 0 : index
    %c0_6 = arith.constant 0 : index
    %15 = vector.load %arg6[%c0_5, %c0_6] : memref<128x128xf32, #tpu.memory_space<vmem>>, vector<128x128xf32>
    %16 = arith.truncf %14 : vector<128x128xf32> to vector<128x128xbf16>
    %c0_7 = arith.constant 0 : index
    %c0_8 = arith.constant 0 : index
    %17 = vector.load %arg4[%c0_7, %c0_8] : memref<128x128xbf16, #tpu.memory_space<vmem>>, vector<128x128xbf16>
    %cst_9 = arith.constant dense<0.000000e+00> : vector<128x128xf32>
    %18 = tpu.matmul %16, %17, %cst_9 {dimension_numbers = #tpu.dot_dimension_numbers<[1], [1], [0], [0], [0, 0, 1, 0], [], []>} : vector<128x128xbf16>, vector<128x128xbf16>, vector<128x128xf32> -> vector<128x128xf32>
    %19 = arith.addf %15, %18 : vector<128x128xf32>
    %c0_10 = arith.constant 0 : index
    %c0_11 = arith.constant 0 : index
    %20 = vector.load %arg6[%c0_10, %c0_11] : memref<128x128xf32, #tpu.memory_space<vmem>>, vector<128x128xf32>
    tpu.vector_store %arg6[%c0_10, %c0_11], %19 {strides = array<i32>} : memref<128x128xf32, #tpu.memory_space<vmem>>, vector<128x128xf32>,
    %c1_i32 = arith.constant 1 : i32
    %21 = arith.cmpi eq, %arg1, %c1_i32 : i32
    %22 = arith.extui %21 : i1 to i32
    %c0_i32_12 = arith.constant 0 : i32
    %23 = arith.cmpi ne, %22, %c0_i32_12 : i32
    scf.if %23 {
      %c0_13 = arith.constant 0 : index
      %c0_14 = arith.constant 0 : index
      %24 = vector.load %arg6[%c0_13, %c0_14] : memref<128x128xf32, #tpu.memory_space<vmem>>, vector<128x128xf32>
      %25 = arith.truncf %24 : vector<128x128xf32> to vector<128x128xbf16>
      %c0_15 = arith.constant 0 : index
      %c0_16 = arith.constant 0 : index
      %26 = vector.load %arg5[%c0_15, %c0_16] : memref<128x128xbf16, #tpu.memory_space<vmem>>, vector<128x128xbf16>
      tpu.vector_store %arg5[%c0_15, %c0_16], %25 {strides = array<i32>} : memref<128x128xbf16, #tpu.memory_space<vmem>>, vector<128x128xbf16>,
    } else {
    }
    return
  }
  func.func @transform_0(%arg0: i32, %arg1: i32) -> (i32, i32) {
    %c0_i32 = arith.constant 0 : i32
    %c0_i32_0 = arith.constant 0 : i32
    return %arg0, %c0_i32 : i32, i32
  }
  func.func @transform_1(%arg0: i32, %arg1: i32) -> (i32, i32) {
    %c0_i32 = arith.constant 0 : i32
    %c0_i32_0 = arith.constant 0 : i32
    return %arg1, %c0_i32 : i32, i32
  }
  func.func @transform_2(%arg0: i32, %arg1: i32) -> (i32, i32) {
    %c0_i32 = arith.constant 0 : i32
    %c0_i32_0 = arith.constant 0 : i32
    return %c0_i32, %arg1 : i32, i32
  }
  func.func @transform_3(%arg0: i32, %arg1: i32) -> (i32, i32) {
    %c0_i32 = arith.constant 0 : i32
    %c0_i32_0 = arith.constant 0 : i32
    return %arg0, %c0_i32 : i32, i32
  }
}

</mosaic_0001>

<bundles_post_ra>
// kernel: tpu_custom_call.1
= control target key start
LH: loop header
LB: loop body
LE: loop exit
PB: predicated region body
PF: predicated region fallthrough
CT: control target
= control target key end

     0   :  { %s2344_s0 = inlined_call_operand.hbm [shape: bf16[256,128], index: 0, kind: input, shape index: {}]   ;;  %s2345_s1 = inlined_call_operand.hbm [shape: bf16[512,128], index: 1, kind: input, shape index: {}]   ;;  %s2346_s2 = inlined_call_operand.hbm [shape: bf16[128,256], index: 2, kind: input, shape index: {}]   ;;  %s2347_s3 = inlined_call_operand.hbm [shape: bf16[256,128], index: 3, kind: output, shape index: {}]  }
   0x1   :  { %2367 = sst [smem:[#allocation22_spill]] %s2345_s1 }
   0x2   :  { %2368 = sst [smem:[#allocation23_spill]] %s2347_s3 }
   0x3   :  { %8 = vsyncpa [#allocation4], 0 }
   0x4   :  { %10 = vsyncpa [#allocation4 + $0x1], 0 }
   0x5   :  { %11 = vsyncpa [#allocation7], 0 }
   0x6   :  { %13 = vsyncpa [#allocation7 + $0x1], 0 }
   0x7   :  { %14 = vsyncpa [#allocation5], 0 }
   0x8   :  { %16 = vsyncpa [#allocation5 + $0x1], 0  ;;  %s1888_s12 = smov 0   ;;  %s1890_s13 = smov 0  }
   0x9   :  { %s1892_s14 = smov 0   ;;  %s1894_s15 = smov 0  }
   0xa   :  { %s1896_s16 = smov 0   ;;  %s1898_s17 = smov 0  }
   0xb   :  { %s1900_s18 = smov 0   ;;  %s1902_s19 = smov 0  }
   0xc   :  { %s1904_s20 = smov 0   ;;  %s1906_s21 = smov 0  }
   0xd   :  { %s1908_s22 = smov 0  }
   0xe LB: > { %2369 = sst [smem:[#allocation13_spill]] %s1824_s14  ;;  %s1942_s23 = sadd.s32 4294967295, %s1856_s22   ;;  %s1856_s22 = sphi %s1908_s22, %s22_s22   ;;  %s1852_s21 = sphi %s1906_s21, %s2410_s21   ;;  %s1848_s20 = sphi %s1904_s20, %s2409_s20   ;;  %s1844_s19 = sphi %s1902_s19, %s2408_s19   ;;  %s1840_s18 = sphi %s1900_s18, %s2407_s18   ;;  %s1836_s17 = sphi %s1898_s17, %s2406_s17   ;;  %s1832_s16 = sphi %s1896_s16, %s2414_s16   ;;  %s1828_s15 = sphi %s1894_s15, %s2413_s15   ;;  %s1824_s14 = sphi %s1892_s14, %s2404_s14   ;;  %s1820_s13 = sphi %s1890_s13, %s2412_s13   ;;  %s1816_s12 = sphi %s1888_s12, %s2411_s12  }
   0xf   : > { %2370 = sst [smem:[#allocation14_spill]] %s1828_s15  ;;  %s31_s24 = sadd.s32 1, %s1848_s20 }
  0x10   : > { %2371 = sst [smem:[#allocation15_spill]] %s1836_s17  ;;  %p1945_p0 = scmp.ge.s32.totalorder %s31_s24, 2 }
  0x11   : > { %2372 = sst [smem:[#allocation16_spill]] %s1848_s20  ;;  %p2351_p1 = scmp.eq.s32.totalorder %s1856_s22, 0 }
  0x12   : > { %2373 = sst [smem:[#allocation17_spill]] %s1852_s21  ;;  %p2350_p2 = scmp.eq.s32.totalorder %s1942_s23, 0 }
  0x13   : > { %s67_s26 = sadd.s32 1, %s1824_s14  ;;  %s2416_s24 = smov (%p1945_p0, %s31_s24), 0 }
  0x14   : > { %2375 = sst [smem:[#allocation18_spill]] %s2416_s24  ;;  %p74_p3 = scmp.ne.s32.totalorder %s1824_s14, %s1820_s13 }
  0x15   : > { %p80_p4 = scmp.ne.s32.totalorder %s1820_s13, %s1816_s12  ;;  %s64_s27 = ssub.s32 %s1848_s20, %s2416_s24 }
  0x16   : > { %p65_p5 = scmp.eq.s32.totalorder %s64_s27, 0  ;;  %p76_p6 = por %p74_p3, %p2351_p1 }
  0x17   : > { %p1965_p7 = por %p80_p4, %p2350_p2  ;;  %p2349_p8 = scmp.lt.s32.totalorder %s1856_s22, 4 }
  0x18   : > { %s1971_s29 = scalar_select %p65_p5, %s1824_s14, %s67_s26  }
  0x19   : > { %s2376_s28 = scalar_select %p1965_p7, 1, 0 }
  0x1a   : > { %2377 = sst [smem:[#allocation19_spill]] %s1971_s29  ;;  %s177_s30 = sand.u32 1, %s1856_s22  }
  0x1b   : > { %s179_s4 = sand.u32 1, %s1824_s14   ;;  %s1281_s6 = sshll.u32 %s1848_s20, 11 }
  0x1c   : > { %s1199_s5 = sshll.u32 %s179_s4, 7  ;;  %s2378_s1 = sld [smem:[#allocation22_spill]] }
  0x1d   : > { %s181_s10 = scalar_lea.vmem [#allocation6], %s1199_s5  ;;  %p1985_p9 = pnand %p2349_p8, %p76_p6 }
  0x1e   : > { %s188_s11 = sshll.u32 %s181_s10, 4  ;;  %s1989_s26 = sshll.u32 %s179_s4, 6  ;;  %s1981_s11 = int_to_ptr.vmem [resolvable:$true] %s188_s11 }
  0x1f   : > { %s1992_s27 = scalar_lea.sflag [#allocation7], %s177_s30  ;;  %p2364_p12 = pneg %p1985_p9 }
  0x22   : > { %s1979_s9 = scalar_lea.hbm %s2378_s1, %s1281_s6  ;;  %s1645_s8 = scalar_lea.hbm %s2378_s1, 4096 }
  0x23   : > { %s1640_s6 = scalar_lea.hbm %s1979_s9, 2048  ;;  %p1646_p4 = scmp.lt.u32.totalorder %s1979_s9, %s2378_s1 }
  0x24   : > { %p1641_p11 = scmp.ne.s32.totalorder %s1979_s9, %s1640_s6  ;;  %p1647_p5 = scmp.lt.u32.totalorder %s1645_s8, %s1640_s6 }
  0x25   : > { %p1649_p8 = scmp.lt.u32.totalorder %s1640_s6, %s1979_s9 }
  0x26   : > { %p1643_p13 = pnand %p2364_p12, %p1641_p11  ;;  %p1648_p6 = por %p1647_p5, %p1646_p4 }
  0x28   : > { %p1644_p3 = pneg %p1643_p13  ;;  %p1650_p2 = por %p1649_p8, %p1648_p6 }
  0x2a   : > { %p1651_p1 = pnand %p1650_p2, %p1644_p3 }
  0x2c   : > { %1654 = shalt.err (!%p1651_p1)
}
  0x2d   : > { %s1655_s30 = scalar_lea.vmem %s1981_s11, 2048  ;;  %s1858_s4 = smov [#allocation6]  }
  0x2e   : > { %p1656_p11 = scmp.ne.s32.totalorder %s1981_s11, %s1655_s30  ;;  %s1660_s5 = sshll.u32 %s1858_s4, 4  ;;  %s1661_s5 = int_to_ptr.vmem [resolvable:$false] %s1660_s5 }
  0x2f   : > { %s1662_s24 = scalar_lea.vmem %s1661_s5, 4096  ;;  %p1663_p7 = scmp.lt.s32.totalorder %s1981_s11, %s1661_s5 }
  0x30   : > { %p1658_p13 = pnand %p1656_p11, %p2364_p12  ;;  %p1664_p4 = scmp.lt.s32.totalorder %s1662_s24, %s1655_s30 }
  0x32   : > { %p1659_p10 = pneg %p1658_p13  ;;  %p1665_p5 = por %p1664_p4, %p1663_p7 }
  0x34   : > { %p1666_p8 = pnand %p1665_p5, %p1659_p10 }
  0x36   : > { %1669 = shalt.err (!%p1666_p8)
}
  0x37   : > { %s2353_s6 = smov 64   ;;  %s2355_s7 = smov 4  }
  0x38   : > { %1440 = dma.hbm_to_vmem [thread:$0]  (!%p1985_p9), %s1979_s9, 2048, %s1981_s11, %s1992_s27, %s2353_s6, %s2353_s6, %s2355_s7  }
  0x39   : > { %s202_s8 = scalar_lea.vmem [#allocation8], %s1989_s26  ;;  %p216_p1 = scmp.lt.s32.totalorder %s1856_s22, 5 }
  0x3a   : > { %s208_s10 = sshll.u32 %s202_s8, 4  ;;  %p2380_p2 = scmp.ge.s32.totalorder %s1856_s22, 1  ;;  %s2025_s10 = int_to_ptr.vmem [resolvable:$true] %s208_s10 }
  0x3b   : > { %s1193_s4 = sadd.s32 4294967294, %s1856_s22   ;;  %s34_s5 = sadd.s32 1, %s1852_s21 }
  0x3c   : > { %p2029_p7 = pnand %p2380_p2, %p216_p1  ;;  %s2418_s5 = smov (!%p1945_p0, %s34_s5), %s1852_s21 }
  0x3d   : > { %s41_s24 = sadd.s32 1, %s1836_s17  ;;  %p48_p10 = scmp.ne.s32.totalorder %s1836_s17, %s1832_s16 }
  0x3e   : > { %s2381_s30 = scalar_select %p2029_p7, 1, 0 }
  0x3f   : > { %p36_p3 = scmp.ge.s32.totalorder %s2418_s5, 2  ;;  %p54_p6 = scmp.ne.s32.totalorder %s1832_s16, %s1828_s15 }
  0x40   : > { %p2382_p11 = scmp.eq.s32.totalorder %s1856_s22, 0  ;;  %p130_p4 = scmp.eq.s32.totalorder %s1942_s23, 3 }
  0x41   : > { %s2420_s5 = smov (%p36_p3, %s2418_s5), 0  ;;  %p2385_p5 = scmp.eq.s32.totalorder %s1942_s23, 0 }
  0x42   : > { %p2045_p13 = por %p2382_p11, %p48_p10  ;;  %2384 = sst [smem:[#allocation20_spill]] %s2420_s5 }
  0x43   : > { %p2054_p8 = por %p2385_p5, %p54_p6  ;;  %p2058_p0 = por %p130_p4, %p48_p10 }
  0x44   : > { %s38_s26 = ssub.s32 %s1852_s21, %s2420_s5  ;;  %p136_p1 = scmp.eq.s32.totalorder %s1193_s4, 3 }
  0x45   : > { %s2386_s25 = scalar_select %p2054_p8, 1, 0 }
  0x46   : > { %s2387_s11 = scalar_select %p2058_p0, 1, 0 }
  0x47   : > { %p39_p2 = scmp.eq.s32.totalorder %s38_s26, 0  ;;  %s156_s8 = sand.u32 1, %s1836_s17  }
  0x48   : > { %p2065_p11 = por %p136_p1, %p54_p6  ;;  %s1196_s1 = sshll.u32 %s156_s8, 6 }
  0x49   : > { %s2070_s7 = scalar_select %p39_p2, %s1836_s17, %s41_s24  }
  0x4a   : > { %s2388_s6 = scalar_select %p2065_p11, 1, 0 }
  0x4b   : > { %2389 = sst [smem:[#allocation21_spill]] %s2070_s7  ;;  %s1280_s29 = sshll.u32 %s1852_s21, 10 }
  0x4c   : > { %s2076_s3 = scalar_lea.hbm %s2344_s0, %s1280_s29  ;;  %s160_s5 = scalar_lea.vmem [#allocation3], %s1196_s1 }
  0x4d   : > { %s167_s4 = sshll.u32 %s160_s5, 4  ;;  %p2390_p10 = scmp.lt.s32.totalorder %s1856_s22, 4  ;;  %s2086_s4 = int_to_ptr.vmem [resolvable:$true] %s167_s4 }
  0x4e   : > { %s1203_s24 = sshll.u32 %s1848_s20, 6  ;;  %s2094_s21 = scalar_lea.sflag [#allocation4], %s156_s8 }
  0x4f   : > { %p2082_p3 = pnand %p2390_p10, %p2045_p13  ;;  %s2092_s29 = scalar_lea.hbm %s2346_s2, %s1203_s24 }
  0x50   : > { %s1670_s1 = scalar_lea.hbm %s2076_s3, 1024  ;;  %s1675_s7 = scalar_lea.hbm %s2344_s0, 2048 }
  0x51   : > { %p1671_p6 = scmp.ne.s32.totalorder %s2076_s3, %s1670_s1  ;;  %p1672_p4 = pneg %p2082_p3 }
  0x52   : > { %p1676_p1 = scmp.lt.u32.totalorder %s2076_s3, %s2344_s0  ;;  %p1677_p2 = scmp.lt.u32.totalorder %s1675_s7, %s1670_s1 }
  0x53   : > { %p1673_p13 = pnand %p1672_p4, %p1671_p6  ;;  %p1679_p12 = scmp.lt.u32.totalorder %s1670_s1, %s2076_s3 }
  0x54   : > { %p1678_p10 = por %p1677_p2, %p1676_p1 }
  0x55   : > { %p1674_p5 = pneg %p1673_p13 }
  0x56   : > { %p1680_p11 = por %p1679_p12, %p1678_p10 }
  0x58   : > { %p1681_p0 = pnand %p1680_p11, %p1674_p5 }
  0x5a   : > { %1684 = shalt.err (!%p1681_p0)
}
  0x5b   : > { %s1685_s8 = scalar_lea.vmem %s2086_s4, 1024  ;;  %s1861_s24 = smov [#allocation3]  }
  0x5c   : > { %p1686_p6 = scmp.ne.s32.totalorder %s2086_s4, %s1685_s8  ;;  %s1690_s14 = sshll.u32 %s1861_s24, 4  ;;  %s1691_s14 = int_to_ptr.vmem [resolvable:$false] %s1690_s14 }
  0x5d   : > { %s1692_s17 = scalar_lea.vmem %s1691_s14, 2048  ;;  %p1693_p7 = scmp.lt.s32.totalorder %s2086_s4, %s1691_s14 }
  0x5e   : > { %p1688_p13 = pnand %p1686_p6, %p1672_p4  ;;  %p1694_p1 = scmp.lt.s32.totalorder %s1692_s17, %s1685_s8 }
  0x60   : > { %p1689_p8 = pneg %p1688_p13  ;;  %p1695_p2 = por %p1694_p1, %p1693_p7 }
  0x62   : > { %p1696_p12 = pnand %p1695_p2, %p1689_p8 }
  0x64   : > { %1699 = shalt.err (!%p1696_p12)
}
  0x65   : > { %s2392_s20 = smov 4   ;;  %s2393_s7 = smov 64  }
  0x66   : > { %1437 = dma.hbm_to_vmem [thread:$0]  (!%p2082_p3), %s2076_s3, 1024, %s2086_s4, %s2094_s21, %s2393_s7, %s2393_s7, %s2392_s20  }
  0x67   : > { %s1700_s15 = scalar_lea.hbm %s2092_s29, 1024  ;;  %p2394_p7 = pneg %p1985_p9 }
  0x68   : > { %p1701_p0 = scmp.ne.s32.totalorder %s2092_s29, %s1700_s15  ;;  %s1705_s5 = scalar_lea.hbm %s2346_s2, 2048 }
  0x69   : > { %p1706_p4 = scmp.lt.u32.totalorder %s2092_s29, %s2346_s2  ;;  %p1707_p5 = scmp.lt.u32.totalorder %s1705_s5, %s1700_s15 }
  0x6a   : > { %p1703_p8 = pnand %p1701_p0, %p2394_p7  ;;  %p1709_p6 = scmp.lt.u32.totalorder %s1700_s15, %s2092_s29 }
  0x6b   : > { %p1708_p10 = por %p1707_p5, %p1706_p4 }
  0x6c   : > { %p1704_p11 = pneg %p1703_p8 }
  0x6d   : > { %p1710_p13 = por %p1709_p6, %p1708_p10 }
  0x6f   : > { %p1711_p1 = pnand %p1710_p13, %p1704_p11 }
  0x71   : > { %1714 = shalt.err (!%p1711_p1)
}
  0x72   : > { %s1715_s3 = scalar_lea.vmem %s2025_s10, 1024  ;;  %p2395_p2 = pmov %p2394_p7 }
  0x73   : > { %p1716_p3 = scmp.ne.s32.totalorder %s2025_s10, %s1715_s3  ;;  %s1862_s21 = smov [#allocation8]  }
  0x74   : > { %s1720_s4 = sshll.u32 %s1862_s21, 4  ;;  %s1721_s4 = int_to_ptr.vmem [resolvable:$false] %s1720_s4 }
  0x75   : > { %p1718_p12 = pnand %p1716_p3, %p2395_p2  ;;  %s1722_s24 = scalar_lea.vmem %s1721_s4, 2048 }
  0x76   : > { %p1723_p7 = scmp.lt.s32.totalorder %s2025_s10, %s1721_s4  ;;  %p1724_p8 = scmp.lt.s32.totalorder %s1722_s24, %s1715_s3 }
  0x77   : > { %p1719_p0 = pneg %p1718_p12 }
  0x78   : > { %p1725_p4 = por %p1724_p8, %p1723_p7 }
  0x7a   : > { %p1726_p5 = pnand %p1725_p4, %p1719_p0 }
  0x7c   : > { %1729 = shalt.err (!%p1726_p5)
}
  0x7d   : > { %s1863_s14 = smov 128   ;;  %p2396_p11 = scmp.ne.s32.totalorder %s2381_s30, 0 }
  0x7e   : > { %1443 = dma.hbm_to_vmem [thread:$0]  (!%p1985_p9), %s2092_s29, 1024, %s2025_s10, %s1992_s27, %s1863_s14, %s2393_s7, %s2392_s20  }
  0x7f   : > { %220 = sbr.rel (%p2396_p11) target bundleno = 773 (0x305), region = 32  ;;  %s2154_s17 = sand.u32 (!%p2396_p11), 1, %s1832_s16  }
  0x80   : > { %s1205_s15 = sshll.u32 (!%p2396_p11), %s2154_s17, 6  ;;  %s223_s1 = scalar_lea.sflag (!%p2396_p11), [#allocation4], %s2154_s17 }
  0x81   : > { %s2158_s26 = scalar_lea.vmem (!%p2396_p11), [#allocation3], %s1205_s15  ;;  %p2397_p10 = scmp.ne.s32.totalorder (!%p2396_p11), %s2386_s25, 0 }
  0x86   : > { %1803 = dma.done.wait (%p2397_p10), %s223_s1, 1024  }
  0x87   : > { %1805 = vsyncadd (%p2397_p10), %s223_s1, 4294966272  ;;  %s231_s12 = sand.u32 1, %s1942_s23   ;;  %s233_s27 = sand.u32 1, %s1820_s13  }
  0x88   : > { %s1206_s10 = sshll.u32 %s233_s27, 7  ;;  %s232_s30 = scalar_lea.sflag [#allocation7], %s231_s12 }
  0x89   : > { %s2166_s29 = scalar_lea.vmem [#allocation6], %s1206_s10  ;;  %p2398_p9 = scmp.ne.s32.totalorder %s2376_s28, 0 }
  0x8b   : > { %1807 = dma.done.wait (%p2398_p9), %s232_s30, 3072  }
  0x8c   : > { %1809 = vsyncadd (%p2398_p9), %s232_s30, 4294964224  ;;  %s1207_s20 = sshll.u32 %s233_s27, 6  ;;  %s2174_s5 = scalar_lea.vmem [#allocation9], %s1205_s15 }
  0x8d   : > { %s2172_s7 = scalar_lea.vmem [#allocation8], %s1207_s20  ;;  %p1209_p6 = scmp.ne.s32.totalorder %s1840_s18, 0 }
  0x8e   : > { %v1864_v0 = vmov (!%p1209_p6), 0.0  }
  0x8f   : > { %284 = sbr.rel (%p1209_p6) target bundleno = 151 (0x97), region = 48  ;;  %285 = vst [vmem:[#allocation2] sm:$0xff] (!%p1209_p6), %v1864_v0  ;;  %286 = vst [vmem:[#allocation2 + $0x8] sm:$0xff] (!%p1209_p6), %v1864_v0 }
  0x90   : > { %287 = vst [vmem:[#allocation2 + $0x10] sm:$0xff] (!%p1209_p6), %v1864_v0  ;;  %288 = vst [vmem:[#allocation2 + $0x18] sm:$0xff] (!%p1209_p6), %v1864_v0 }
  0x91   : > { %289 = vst [vmem:[#allocation2 + $0x20] sm:$0xff] (!%p1209_p6), %v1864_v0  ;;  %290 = vst [vmem:[#allocation2 + $0x28] sm:$0xff] (!%p1209_p6), %v1864_v0 }
  0x92   : > { %291 = vst [vmem:[#allocation2 + $0x30] sm:$0xff] (!%p1209_p6), %v1864_v0  ;;  %292 = vst [vmem:[#allocation2 + $0x38] sm:$0xff] (!%p1209_p6), %v1864_v0 }
  0x93   : > { %293 = vst [vmem:[#allocation2 + $0x40] sm:$0xff] (!%p1209_p6), %v1864_v0  ;;  %294 = vst [vmem:[#allocation2 + $0x48] sm:$0xff] (!%p1209_p6), %v1864_v0 }
  0x94   : > { %295 = vst [vmem:[#allocation2 + $0x50] sm:$0xff] (!%p1209_p6), %v1864_v0  ;;  %296 = vst [vmem:[#allocation2 + $0x58] sm:$0xff] (!%p1209_p6), %v1864_v0 }
  0x95   : > { %297 = vst [vmem:[#allocation2 + $0x60] sm:$0xff] (!%p1209_p6), %v1864_v0  ;;  %298 = vst [vmem:[#allocation2 + $0x68] sm:$0xff] (!%p1209_p6), %v1864_v0 }
  0x96   : > { %299 = vst [vmem:[#allocation2 + $0x70] sm:$0xff] %v1864_v0  ;;  %300 = vst [vmem:[#allocation2 + $0x78] sm:$0xff] %v1864_v0 }
  0x97 PF: > { %v1544_v1 = vld [vmem:[%s2166_s29 + $0x40] sm:$0xff]   ;;  %v1546_v3 = vld [vmem:[%s2166_s29 + $0x48] sm:$0xff]   ;;  %v1548_v5 = vld [vmem:[%s2166_s29 + $0x50] sm:$0xff]   ;;  %p1258_p13 = scmp.ne.s32.totalorder %s1840_s18, 1 }
  0x98   : > { %v1545_v2 = vld [vmem:[%s2166_s29] sm:$0xff]   ;;  %1346 = vmatprep.subr.bf16.mxu0 %v1544_v1  ;;  %v1547_v4 = vld [vmem:[%s2166_s29 + $0x8] sm:$0xff]   ;;  %v1549_v6 = vld [vmem:[%s2166_s29 + $0x10] sm:$0xff]  }
  0x99   : > { %1347 = vmatpush3.bf16.xpose.msra.mxu0 %v1545_v2  ;;  %v1550_v7 = vld [vmem:[%s2166_s29 + $0x58] sm:$0xff]   ;;  %v1560_v8 = vld [vmem:[%s2158_s26] sm:$0xff]   ;;  %v1569_v12 = vld [vmem:[%s2172_s7 + $0x8] sm:$0xff]  }
  0x9a   : > { %1348 = vmatprep.subr.bf16.mxu0 %v1546_v3  ;;  %1362 = vmatprep.mubr.bf16.mxu0 %v1560_v8  ;;  %v1551_v9 = vld [vmem:[%s2166_s29 + $0x18] sm:$0xff]   ;;  %v1552_v10 = vld [vmem:[%s2166_s29 + $0x60] sm:$0xff]   ;;  %v1554_v14 = vld [vmem:[%s2166_s29 + $0x68] sm:$0xff]  }
  0x9b   : > { %v1568_v11 = vld [vmem:[%s2172_s7] sm:$0xff]   ;;  %v1570_v15 = vld [vmem:[%s2172_s7 + $0x10] sm:$0xff]   ;;  %v1555_v16 = vld [vmem:[%s2166_s29 + $0x28] sm:$0xff]  }
  0x9c   : > { %1394 = vmatprep.subr.bf16.mxu1 %v1568_v11  ;;  %v1553_v13 = vld [vmem:[%s2166_s29 + $0x20] sm:$0xff]   ;;  %v1556_v17 = vld [vmem:[%s2166_s29 + $0x70] sm:$0xff]   ;;  %v1558_v19 = vld [vmem:[%s2166_s29 + $0x78] sm:$0xff]  }
  0x9d   : > { %1395 = vmatpush3.bf16.xpose.msra.mxu1 %v1568_v11  ;;  %v1557_v18 = vld [vmem:[%s2166_s29 + $0x30] sm:$0xff]   ;;  %v1559_v20 = vld [vmem:[%s2166_s29 + $0x38] sm:$0xff]   ;;  %v1561_v21 = vld [vmem:[%s2158_s26 + $0x8] sm:$0xff]  }
  0x9e   : > { %1396 = vmatprep.subr.bf16.mxu1 %v1569_v12  ;;  %v1562_v22 = vld [vmem:[%s2158_s26 + $0x10] sm:$0xff]   ;;  %v1563_v23 = vld [vmem:[%s2158_s26 + $0x18] sm:$0xff]   ;;  %v1564_v24 = vld [vmem:[%s2158_s26 + $0x20] sm:$0xff]  }
  0x9f   : > { %v1565_v25 = vld [vmem:[%s2158_s26 + $0x28] sm:$0xff]   ;;  %v1566_v26 = vld [vmem:[%s2158_s26 + $0x30] sm:$0xff]   ;;  %v1567_v27 = vld [vmem:[%s2158_s26 + $0x38] sm:$0xff]  }
  0xa0   : > { %v1571_v28 = vld [vmem:[%s2172_s7 + $0x18] sm:$0xff]   ;;  %v1572_v29 = vld [vmem:[%s2172_s7 + $0x20] sm:$0xff]   ;;  %v1573_v30 = vld [vmem:[%s2172_s7 + $0x28] sm:$0xff]  }
  0xa1   : > { %1349 = vmatpush3.bf16.xpose.msra.mxu0 %v1547_v4  ;;  %v1574_v31 = vld [vmem:[%s2172_s7 + $0x30] sm:$0xff]   ;;  %v1575_v32 = vld [vmem:[%s2172_s7 + $0x38] sm:$0xff]  }
  0xa2   : > { %1350 = vmatprep.subr.bf16.mxu0 %v1548_v5 }
  0xa5   : > { %1397 = vmatpush3.bf16.xpose.msra.mxu1 %v1569_v12 }
  0xa6   : > { %1398 = vmatprep.subr.bf16.mxu1 %v1570_v15 }
  0xa9   : > { %1351 = vmatpush3.bf16.xpose.msra.mxu0 %v1549_v6 }
  0xaa   : > { %1352 = vmatprep.subr.bf16.mxu0 %v1550_v7 }
  0xad   : > { %1399 = vmatpush3.bf16.xpose.msra.mxu1 %v1570_v15 }
  0xae   : > { %1400 = vmatprep.subr.bf16.mxu1 %v1571_v28 }
  0xb1   : > { %1353 = vmatpush3.bf16.xpose.msra.mxu0 %v1551_v9 }
  0xb2   : > { %1354 = vmatprep.subr.bf16.mxu0 %v1552_v10 }
  0xb5   : > { %1401 = vmatpush3.bf16.xpose.msra.mxu1 %v1571_v28 }
  0xb6   : > { %1402 = vmatprep.subr.bf16.mxu1 %v1572_v29 }
  0xb9   : > { %1355 = vmatpush3.bf16.xpose.msra.mxu0 %v1553_v13 }
  0xba   : > { %1356 = vmatprep.subr.bf16.mxu0 %v1554_v14 }
  0xbd   : > { %1403 = vmatpush3.bf16.xpose.msra.mxu1 %v1572_v29 }
  0xbe   : > { %1404 = vmatprep.subr.bf16.mxu1 %v1573_v30 }
  0xc1   : > { %1357 = vmatpush3.bf16.xpose.msra.mxu0 %v1555_v16 }
  0xc2   : > { %1358 = vmatprep.subr.bf16.mxu0 %v1556_v17 }
  0xc5   : > { %1405 = vmatpush3.bf16.xpose.msra.mxu1 %v1573_v30 }
  0xc6   : > { %1406 = vmatprep.subr.bf16.mxu1 %v1574_v31 }
  0xc9   : > { %1359 = vmatpush3.bf16.xpose.msra.mxu0 %v1557_v18 }
  0xca   : > { %1360 = vmatprep.subr.bf16.mxu0 %v1558_v19 }
  0xcd   : > { %1407 = vmatpush3.bf16.xpose.msra.mxu1 %v1574_v31 }
  0xce   : > { %1408 = vmatprep.subr.bf16.mxu1 %v1575_v32 }
  0xd1   : > { %1361 = vmatpush3.bf16.xpose.msra.mxu0 %v1559_v20 }
  0xd5   : > { %1409 = vmatpush3.bf16.xpose.msra.mxu1 %v1575_v32 }
  0xd8   : > { %1363 = vmatmul.mubr.bf16.vlgmr.msra.gmra.mrb[0].mxu0 %v1560_v8 }
  0xd9   : > { %1364 = vmatprep.mubr.bf16.mxu0 %v1561_v21 }
  0xe0   : > { %1365 = vmatmul.mubr.bf16.gmra.mrb[4].mxu0 %v1561_v21 }
  0xe1   : > { %1366 = vmatprep.mubr.bf16.mxu0 %v1562_v22 }
  0xe8   : > { %1367 = vmatmul.mubr.bf16.gmra.mrb[8].mxu0 %v1562_v22 }
  0xe9   : > { %1368 = vmatprep.mubr.bf16.mxu0 %v1563_v23 }
  0xf0   : > { %1369 = vmatmul.mubr.bf16.gmra.mrb[12].mxu0 %v1563_v23 }
  0xf1   : > { %1370 = vmatprep.mubr.bf16.mxu0 %v1564_v24 }
  0xf8   : > { %1371 = vmatmul.mubr.bf16.gmra.mrb[16].mxu0 %v1564_v24 }
  0xf9   : > { %1372 = vmatprep.mubr.bf16.mxu0 %v1565_v25 }
 0x100   : > { %1373 = vmatmul.mubr.bf16.gmra.mrb[20].mxu0 %v1565_v25 }
 0x101   : > { %1374 = vmatprep.mubr.bf16.mxu0 %v1566_v26 }
 0x108   : > { %1375 = vmatmul.mubr.bf16.gmra.mrb[24].mxu0 %v1566_v26 }
 0x109   : > { %1376 = vmatprep.mubr.bf16.mxu0 %v1567_v27 }
 0x110   : > { %1377 = vmatmul.mubr.bf16.gmra.mrb[28].mxu0 %v1567_v27 }
 0x1ab   : > { %v527_v33 = vpop.f32.mrb[0].mxu0 }
 0x1ac   : > { %v1234_v34 = vmul.f32 -1.442695, %v527_v33  ;;  %v529_v35 = vpop.f32.mrb[1].mxu0 }
 0x1ad   : > { %v531_v36 = vpop.f32.mrb[2].mxu0 }
 0x1ae   : > { %1576 = vpow2.f32 %v1234_v34  ;;  %v1235_v37 = vmul.f32 -1.442695, %v531_v36  ;;  %v533_v38 = vpop.f32.mrb[3].mxu0 }
 0x1b0   : > { %1578 = vpow2.f32 %v1235_v37 }
 0x1b3   : > { %v537_v39 = vpop.f32.mrb[4].mxu0 }
 0x1b4   : > { %v1236_v40 = vmul.f32 -1.442695, %v537_v39  ;;  %v539_v41 = vpop.f32.mrb[5].mxu0 }
 0x1b5   : > { %v541_v42 = vpop.f32.mrb[6].mxu0 }
 0x1b6   : > { %1580 = vpow2.f32 %v1236_v40  ;;  %v1237_v43 = vmul.f32 -1.442695, %v541_v42  ;;  %v543_v44 = vpop.f32.mrb[7].mxu0 }
 0x1b8   : > { %v1577_v45 = vpop.eup %1576  ;;  %1582 = vpow2.f32 %v1237_v43 }
 0x1b9   : > { %v654_v46 = vadd.f32 1.0, %v1577_v45 }
 0x1ba   : > { %v1579_v47 = vpop.eup %1578 }
 0x1bb   : > { %1584 = vrcp.f32 %v654_v46  ;;  %v655_v48 = vadd.f32 1.0, %v1579_v47  ;;  %v2209_v49 = vpop.f32.mrb[8].mxu0 }
 0x1bc   : > { %v1238_v50 = vmul.f32 -1.442695, %v2209_v49  ;;  %v2212_v51 = vpop.f32.mrb[9].mxu0 }
 0x1bd   : > { %1586 = vrcp.f32 %v655_v48  ;;  %v2214_v52 = vpop.f32.mrb[10].mxu0 }
 0x1be   : > { %1588 = vpow2.f32 %v1238_v50  ;;  %v1239_v53 = vmul.f32 -1.442695, %v2214_v52  ;;  %v2217_v54 = vpop.f32.mrb[11].mxu0 }
 0x1c0   : > { %v1581_v55 = vpop.eup %1580  ;;  %1590 = vpow2.f32 %v1239_v53 }
 0x1c1   : > { %v656_v56 = vadd.f32 1.0, %v1581_v55 }
 0x1c2   : > { %v1583_v57 = vpop.eup %1582 }
 0x1c3   : > { %1592 = vrcp.f32 %v656_v56  ;;  %v657_v58 = vadd.f32 1.0, %v1583_v57  ;;  %v2219_v59 = vpop.f32.mrb[12].mxu0 }
 0x1c4   : > { %v1240_v60 = vmul.f32 -1.442695, %v2219_v59  ;;  %v2222_v61 = vpop.f32.mrb[13].mxu0 }
 0x1c5   : > { %v1585_v62 = vpop.eup %1584  ;;  %1594 = vrcp.f32 %v657_v58  ;;  %v2224_v63 = vpop.f32.mrb[14].mxu0 }
 0x1c6   : > { %v702_v0 = vmul.f32 %v1585_v62, %v527_v33  ;;  %1596 = vpow2.f32 %v1240_v60  ;;  %v1241_v1 = vmul.f32 -1.442695, %v2224_v63  ;;  %v2227_v2 = vpop.f32.mrb[15].mxu0 }
 0x1c7   : > { %v1587_v3 = vpop.eup %1586 }
 0x1c8   : > { %v1589_v4 = vpop.eup %1588  ;;  %v718_v5 = vmul.f32 %v702_v0, %v529_v35  ;;  %v703_v6 = vmul.f32 %v1587_v3, %v531_v36  ;;  %1598 = vpow2.f32 %v1241_v1 }
 0x1c9   : > { %v658_v7 = vadd.f32 1.0, %v1589_v4 }
 0x1ca   : > { %v1591_v8 = vpop.eup %1590  ;;  %v719_v9 = vmul.f32 %v703_v6, %v533_v38 }
 0x1cb   : > { %1600 = vrcp.f32 %v658_v7  ;;  %v659_v10 = vadd.f32 1.0, %v1591_v8  ;;  %v2229_v11 = vpop.f32.mrb[16].mxu0 }
 0x1cc   : > { %v1242_v12 = vmul.f32 -1.442695, %v2229_v11  ;;  %v2232_v13 = vpop.f32.mrb[17].mxu0  ;;  %v750_v14 = vpack.c.bf16 %v719_v9, %v718_v5 }
 0x1cd   : > { %v1593_v15 = vpop.eup %1592  ;;  %1602 = vrcp.f32 %v659_v10  ;;  %v2234_v16 = vpop.f32.mrb[18].mxu0 }
 0x1ce   : > { %v704_v17 = vmul.f32 %v1593_v15, %v537_v39  ;;  %1604 = vpow2.f32 %v1242_v12  ;;  %v1243_v18 = vmul.f32 -1.442695, %v2234_v16  ;;  %v2237_v19 = vpop.f32.mrb[19].mxu0  ;;  %1410 = vmatprep.mubr.bf16.mxu1 %v750_v14 }
 0x1cf   : > { %v1595_v20 = vpop.eup %1594 }
 0x1d0   : > { %v1597_v21 = vpop.eup %1596  ;;  %v720_v22 = vmul.f32 %v704_v17, %v539_v41  ;;  %v705_v23 = vmul.f32 %v1595_v20, %v541_v42  ;;  %1606 = vpow2.f32 %v1243_v18 }
 0x1d1   : > { %v660_v24 = vadd.f32 1.0, %v1597_v21 }
 0x1d2   : > { %v1599_v25 = vpop.eup %1598  ;;  %v721_v26 = vmul.f32 %v705_v23, %v543_v44 }
 0x1d3   : > { %1608 = vrcp.f32 %v660_v24  ;;  %v661_v27 = vadd.f32 1.0, %v1599_v25  ;;  %v2239_v28 = vpop.f32.mrb[20].mxu0 }
 0x1d4   : > { %v751_v29 = vpack.c.bf16 %v721_v26, %v720_v22  ;;  %v1244_v30 = vmul.f32 -1.442695, %v2239_v28  ;;  %v2242_v31 = vpop.f32.mrb[21].mxu0 }
 0x1d5   : > { %v1601_v32 = vpop.eup %1600  ;;  %1610 = vrcp.f32 %v661_v27  ;;  %v2244_v33 = vpop.f32.mrb[22].mxu0 }
 0x1d6   : > { %v706_v34 = vmul.f32 %v1601_v32, %v2209_v49  ;;  %1612 = vpow2.f32 %v1244_v30  ;;  %v1245_v35 = vmul.f32 -1.442695, %v2244_v33  ;;  %v2248_v36 = vpop.f32.mrb[23].mxu0  ;;  %1411 = vmatmul.mubr.bf16.vlgmr.msra.gmra.mrb[0].mxu1 %v751_v29 }
 0x1d7   : > { %v1603_v37 = vpop.eup %1602 }
 0x1d8   : > { %v1605_v38 = vpop.eup %1604  ;;  %v722_v39 = vmul.f32 %v706_v34, %v2212_v51  ;;  %v707_v40 = vmul.f32 %v1603_v37, %v2214_v52  ;;  %1614 = vpow2.f32 %v1245_v35 }
 0x1d9   : > { %v662_v41 = vadd.f32 1.0, %v1605_v38 }
 0x1da   : > { %v1607_v42 = vpop.eup %1606  ;;  %v723_v43 = vmul.f32 %v707_v40, %v2217_v54 }
 0x1db   : > { %1616 = vrcp.f32 %v662_v41  ;;  %v663_v44 = vadd.f32 1.0, %v1607_v42  ;;  %v587_v45 = vpop.f32.mrb[24].mxu0  ;;  %v736_v41 = vld [vmem:[#allocation2 + $0x10] sm:$0xff]  ;;  %v734_v42 = vld [vmem:[#allocation2] sm:$0xff] }
 0x1dc   : > { %v752_v46 = vpack.c.bf16 %v723_v43, %v722_v39  ;;  %v1246_v47 = vmul.f32 -1.442695, %v587_v45  ;;  %v589_v48 = vpop.f32.mrb[25].mxu0 }
 0x1dd   : > { %v1609_v49 = vpop.eup %1608  ;;  %1618 = vrcp.f32 %v663_v44  ;;  %v591_v50 = vpop.f32.mrb[26].mxu0  ;;  %v737_v44 = vld [vmem:[#allocation2 + $0x18] sm:$0xff] }
 0x1de   : > { %v708_v53 = vmul.f32 %v1609_v49, %v2219_v59  ;;  %1620 = vpow2.f32 %v1246_v47  ;;  %v1247_v51 = vmul.f32 -1.442695, %v591_v50  ;;  %v593_v55 = vpop.f32.mrb[27].mxu0  ;;  %1414 = vmatprep.mubr.bf16.mxu1 %v752_v46  ;;  %v735_v47 = vld [vmem:[#allocation2 + $0x8] sm:$0xff] }
 0x1df   : > { %v1611_v52 = vpop.eup %1610 }
 0x1e0   : > { %v1613_v56 = vpop.eup %1612  ;;  %v724_v57 = vmul.f32 %v708_v53, %v2222_v61  ;;  %v709_v54 = vmul.f32 %v1611_v52, %v2224_v63  ;;  %1622 = vpow2.f32 %v1247_v51  ;;  %v738_v52 = vld [vmem:[#allocation2 + $0x20] sm:$0xff] }
 0x1e1   : > { %v664_v58 = vadd.f32 1.0, %v1613_v56 }
 0x1e2   : > { %v1615_v60 = vpop.eup %1614  ;;  %v725_v62 = vmul.f32 %v709_v54, %v2227_v2 }
 0x1e3   : > { %1624 = vrcp.f32 %v664_v58  ;;  %v665_v0 = vadd.f32 1.0, %v1615_v60  ;;  %v597_v1 = vpop.f32.mrb[28].mxu0  ;;  %v739_v60 = vld [vmem:[#allocation2 + $0x28] sm:$0xff] }
 0x1e4   : > { %v753_v3 = vpack.c.bf16 %v725_v62, %v724_v57  ;;  %v1248_v59 = vmul.f32 -1.442695, %v597_v1  ;;  %v599_v4 = vpop.f32.mrb[29].mxu0  ;;  %v741_v57 = vld [vmem:[#allocation2 + $0x38] sm:$0xff] }
 0x1e5   : > { %v1617_v5 = vpop.eup %1616  ;;  %1626 = vrcp.f32 %v665_v0  ;;  %v601_v6 = vpop.f32.mrb[30].mxu0 }
 0x1e6   : > { %v710_v7 = vmul.f32 %v1617_v5, %v2229_v11  ;;  %1628 = vpow2.f32 %v1248_v59  ;;  %v1249_v61 = vmul.f32 -1.442695, %v601_v6  ;;  %v603_v8 = vpop.f32.mrb[31].mxu0  ;;  %1415 = vmatmul.mubr.bf16.gmra.mrb[4].mxu1 %v753_v3  ;;  %v742_v5 = vld [vmem:[#allocation2 + $0x40] sm:$0xff] }
 0x1e7   : > { %v1619_v63 = vpop.eup %1618 }
 0x1e8   : > { %v1621_v9 = vpop.eup %1620  ;;  %v726_v10 = vmul.f32 %v710_v7, %v2232_v13  ;;  %v711_v2 = vmul.f32 %v1619_v63, %v2234_v16  ;;  %1630 = vpow2.f32 %v1249_v61  ;;  %v745_v7 = vld [vmem:[#allocation2 + $0x58] sm:$0xff]  ;;  %v743_v63 = vld [vmem:[#allocation2 + $0x48] sm:$0xff] }
 0x1e9   : > { %v666_v12 = vadd.f32 1.0, %v1621_v9 }
 0x1ea   : > { %v1623_v14 = vpop.eup %1622  ;;  %v727_v15 = vmul.f32 %v711_v2, %v2237_v19 }
 0x1eb   : > { %1632 = vrcp.f32 %v666_v12  ;;  %v667_v17 = vadd.f32 1.0, %v1623_v14 }
 0x1ec   : > { %v754_v18 = vpack.c.bf16 %v727_v15, %v726_v10  ;;  %v748_v15 = vld [vmem:[#allocation2 + $0x70] sm:$0xff] }
 0x1ed   : > { %v1625_v20 = vpop.eup %1624  ;;  %1634 = vrcp.f32 %v667_v17  ;;  %v746_v17 = vld [vmem:[#allocation2 + $0x60] sm:$0xff] }
 0x1ee   : > { %v712_v11 = vmul.f32 %v1625_v20, %v2239_v28  ;;  %1418 = vmatprep.mubr.bf16.mxu1 %v754_v18  ;;  %v749_v20 = vld [vmem:[#allocation2 + $0x78] sm:$0xff] }
 0x1ef   : > { %v1627_v21 = vpop.eup %1626 }
 0x1f0   : > { %v1629_v22 = vpop.eup %1628  ;;  %v728_v23 = vmul.f32 %v712_v11, %v2242_v31  ;;  %v713_v13 = vmul.f32 %v1627_v21, %v2244_v33 }
 0x1f1   : > { %v668_v16 = vadd.f32 1.0, %v1629_v22  ;;  %v747_v22 = vld [vmem:[#allocation2 + $0x68] sm:$0xff] }
 0x1f2   : > { %v1631_v24 = vpop.eup %1630  ;;  %v729_v25 = vmul.f32 %v713_v13, %v2248_v36 }
 0x1f3   : > { %1636 = vrcp.f32 %v668_v16  ;;  %v669_v19 = vadd.f32 1.0, %v1631_v24 }
 0x1f4   : > { %v755_v26 = vpack.c.bf16 %v729_v25, %v728_v23 }
 0x1f5   : > { %v1633_v27 = vpop.eup %1632  ;;  %1638 = vrcp.f32 %v669_v19 }
 0x1f6   : > { %v714_v29 = vmul.f32 %v1633_v27, %v587_v45  ;;  %1419 = vmatmul.mubr.bf16.gmra.mrb[8].mxu1 %v755_v26 }
 0x1f7   : > { %v1635_v30 = vpop.eup %1634 }
 0x1f8   : > { %v730_v28 = vmul.f32 %v714_v29, %v589_v48  ;;  %v715_v32 = vmul.f32 %v1635_v30, %v591_v50 }
 0x1fa   : > { %v731_v34 = vmul.f32 %v715_v32, %v593_v55  ;;  %v740_v55 = vld [vmem:[#allocation2 + $0x30] sm:$0xff] }
 0x1fc   : > { %v756_v35 = vpack.c.bf16 %v731_v34, %v730_v28 }
 0x1fd   : > { %v1637_v37 = vpop.eup %1636 }
 0x1fe   : > { %v716_v31 = vmul.f32 %v1637_v37, %v597_v1  ;;  %1422 = vmatprep.mubr.bf16.mxu1 %v756_v35 }
 0x1ff   : > { %v1639_v33 = vpop.eup %1638 }
 0x200   : > { %v732_v38 = vmul.f32 %v716_v31, %v599_v4  ;;  %v717_v39 = vmul.f32 %v1639_v33, %v601_v6  ;;  %v744_v4 = vld [vmem:[#allocation2 + $0x50] sm:$0xff] }
 0x202   : > { %v733_v40 = vmul.f32 %v717_v39, %v603_v8 }
 0x204   : > { %v757_v36 = vpack.c.bf16 %v733_v40, %v732_v38 }
 0x206   : > { %1423 = vmatmul.mubr.bf16.gmra.mrb[12].mxu1 %v757_v36 }
 0x2a9   : > { %v1412_v43 = vpop.f32.mrb[0].mxu1 }
 0x2aa   : > { %v921_v45 = vadd.f32 %v1412_v43, %v736_v41  ;;  %v856_v46 = vpop.f32.mrb[1].mxu1 }
 0x2ab   : > { %v919_v48 = vadd.f32 %v856_v46, %v734_v42  ;;  %v1413_v49 = vpop.f32.mrb[2].mxu1 }
 0x2ac   : > { %937 = vst [vmem:[#allocation2 + $0x10] sm:$0xff] %v921_v45  ;;  %v922_v50 = vadd.f32 %v1413_v49, %v737_v44  ;;  %v859_v53 = vpop.f32.mrb[3].mxu1 }
 0x2ad   : > { %935 = vst [vmem:[#allocation2] sm:$0xff] %v919_v48  ;;  %v920_v51 = vadd.f32 %v859_v53, %v735_v47 }
 0x2ae   : > { %938 = vst [vmem:[#allocation2 + $0x18] sm:$0xff] %v922_v50 }
 0x2af   : > { %936 = vst [vmem:[#allocation2 + $0x8] sm:$0xff] %v920_v51 }
 0x2b3   : > { %v957_v27 = vld [vmem:[#allocation2 + $0x10] sm:$0xff] (!%p1258_p13) }
 0x2b4   : > { %v955_v19 = vld [vmem:[#allocation2] sm:$0xff] (!%p1258_p13) }
 0x2b5   : > { %v958_v30 = vld [vmem:[#allocation2 + $0x18] sm:$0xff] (!%p1258_p13) }
 0x2b6   : > { %v956_v26 = vld [vmem:[#allocation2 + $0x8] sm:$0xff] (!%p1258_p13)  ;;  %v1307_v34 = vpack.c.bf16 (!%p1258_p13), %v958_v30, %v957_v27 }
 0x2b7   : > { %v1302_v29 = vpack.c.bf16 (!%p1258_p13), %v956_v26, %v955_v19 }
 0x2b8   : > { %1339 = vst [vmem:[%s2174_s5 + $0x8] sm:$0xff] (!%p1258_p13), %v1307_v34  }
 0x2b9   : > { %v1416_v56 = vpop.f32.mrb[4].mxu1  ;;  %1303 = vst [vmem:[%s2174_s5] sm:$0xff] (!%p1258_p13), %v1302_v29  }
 0x2ba   : > { %v925_v54 = vadd.f32 %v1416_v56, %v740_v55  ;;  %v872_v58 = vpop.f32.mrb[5].mxu1 }
 0x2bb   : > { %v923_v62 = vadd.f32 %v872_v58, %v738_v52  ;;  %v1417_v0 = vpop.f32.mrb[6].mxu1 }
 0x2bc   : > { %941 = vst [vmem:[#allocation2 + $0x30] sm:$0xff] %v925_v54  ;;  %v926_v1 = vadd.f32 %v1417_v0, %v741_v57  ;;  %v875_v3 = vpop.f32.mrb[7].mxu1 }
 0x2bd   : > { %939 = vst [vmem:[#allocation2 + $0x20] sm:$0xff] %v923_v62  ;;  %v924_v59 = vadd.f32 %v875_v3, %v739_v60 }
 0x2be   : > { %942 = vst [vmem:[#allocation2 + $0x38] sm:$0xff] %v926_v1 }
 0x2bf   : > { %940 = vst [vmem:[#allocation2 + $0x28] sm:$0xff] %v924_v59 }
 0x2c3   : > { %v961_v37 = vld [vmem:[#allocation2 + $0x30] sm:$0xff] (!%p1258_p13) }
 0x2c4   : > { %v959_v28 = vld [vmem:[#allocation2 + $0x20] sm:$0xff] (!%p1258_p13) }
 0x2c5   : > { %v962_v31 = vld [vmem:[#allocation2 + $0x38] sm:$0xff] (!%p1258_p13) }
 0x2c6   : > { %v960_v32 = vld [vmem:[#allocation2 + $0x28] sm:$0xff] (!%p1258_p13)  ;;  %v1317_v38 = vpack.c.bf16 (!%p1258_p13), %v962_v31, %v961_v37 }
 0x2c7   : > { %v1312_v35 = vpack.c.bf16 (!%p1258_p13), %v960_v32, %v959_v28 }
 0x2c8   : > { %1341 = vst [vmem:[%s2174_s5 + $0x18] sm:$0xff] (!%p1258_p13), %v1317_v38  }
 0x2c9   : > { %v1420_v6 = vpop.f32.mrb[8].mxu1  ;;  %1340 = vst [vmem:[%s2174_s5 + $0x10] sm:$0xff] (!%p1258_p13), %v1312_v35  }
 0x2ca   : > { %v929_v61 = vadd.f32 %v1420_v6, %v744_v4  ;;  %v888_v8 = vpop.f32.mrb[9].mxu1 }
 0x2cb   : > { %v927_v9 = vadd.f32 %v888_v8, %v742_v5  ;;  %v1421_v10 = vpop.f32.mrb[10].mxu1 }
 0x2cc   : > { %945 = vst [vmem:[#allocation2 + $0x50] sm:$0xff] %v929_v61  ;;  %v930_v2 = vadd.f32 %v1421_v10, %v745_v7  ;;  %v891_v12 = vpop.f32.mrb[11].mxu1 }
 0x2cd   : > { %943 = vst [vmem:[#allocation2 + $0x40] sm:$0xff] %v927_v9  ;;  %v928_v14 = vadd.f32 %v891_v12, %v743_v63 }
 0x2ce   : > { %946 = vst [vmem:[#allocation2 + $0x58] sm:$0xff] %v930_v2 }
 0x2cf   : > { %944 = vst [vmem:[#allocation2 + $0x48] sm:$0xff] %v928_v14 }
 0x2d3   : > { %v965_v40 = vld [vmem:[#allocation2 + $0x50] sm:$0xff] (!%p1258_p13) }
 0x2d4   : > { %v963_v33 = vld [vmem:[#allocation2 + $0x40] sm:$0xff] (!%p1258_p13) }
 0x2d5   : > { %v966_v36 = vld [vmem:[#allocation2 + $0x58] sm:$0xff] (!%p1258_p13) }
 0x2d6   : > { %v964_v39 = vld [vmem:[#allocation2 + $0x48] sm:$0xff] (!%p1258_p13)  ;;  %v1327_v42 = vpack.c.bf16 (!%p1258_p13), %v966_v36, %v965_v40 }
 0x2d7   : > { %v1322_v41 = vpack.c.bf16 (!%p1258_p13), %v964_v39, %v963_v33 }
 0x2d8   : > { %1343 = vst [vmem:[%s2174_s5 + $0x28] sm:$0xff] (!%p1258_p13), %v1327_v42  }
 0x2d9   : > { %v1424_v18 = vpop.f32.mrb[12].mxu1  ;;  %954 = sbr.rel (%p1258_p13) target bundleno = 746 (0x2ea), region = 52  ;;  %1342 = vst [vmem:[%s2174_s5 + $0x20] sm:$0xff] (!%p1258_p13), %v1322_v41  }
 0x2da   : > { %v933_v11 = vadd.f32 %v1424_v18, %v748_v15  ;;  %v904_v21 = vpop.f32.mrb[13].mxu1 }
 0x2db   : > { %v931_v23 = vadd.f32 %v904_v21, %v746_v17  ;;  %v1425_v13 = vpop.f32.mrb[14].mxu1 }
 0x2dc   : > { %949 = vst [vmem:[#allocation2 + $0x70] sm:$0xff] %v933_v11  ;;  %v934_v16 = vadd.f32 %v1425_v13, %v749_v20  ;;  %v907_v24 = vpop.f32.mrb[15].mxu1 }
 0x2dd   : > { %947 = vst [vmem:[#allocation2 + $0x60] sm:$0xff] %v931_v23  ;;  %v932_v25 = vadd.f32 %v907_v24, %v747_v22 }
 0x2de   : > { %950 = vst [vmem:[#allocation2 + $0x78] sm:$0xff] %v934_v16 }
 0x2df   : > { %948 = vst [vmem:[#allocation2 + $0x68] sm:$0xff] %v932_v25 }
 0x2e3   : > { %v969_v45 = vld [vmem:[#allocation2 + $0x70] sm:$0xff] }
 0x2e4   : > { %v967_v43 = vld [vmem:[#allocation2 + $0x60] sm:$0xff] }
 0x2e5   : > { %v970_v47 = vld [vmem:[#allocation2 + $0x78] sm:$0xff] }
 0x2e6   : > { %v968_v44 = vld [vmem:[#allocation2 + $0x68] sm:$0xff]  ;;  %v1337_v48 = vpack.c.bf16 %v970_v47, %v969_v45 }
 0x2e7   : > { %v1332_v46 = vpack.c.bf16 %v968_v44, %v967_v43 }
 0x2e8   : > { %1345 = vst [vmem:[%s2174_s5 + $0x38] sm:$0xff] %v1337_v48  }
 0x2e9   : > { %1344 = vst [vmem:[%s2174_s5 + $0x30] sm:$0xff] %v1332_v46  }
 0x2ea PF: > { %s1298_s18 = sshll.u32 %s1844_s19, 10  ;;  %s2399_s25 = sld [smem:[#allocation23_spill]] }
 0x2eb   : > { %s1065_s8 = sshll.u32 %s2174_s5, 4  ;;  %s1052_s3 = scalar_lea.sflag [#allocation5], %s2154_s17  ;;  %s2281_s8 = int_to_ptr.vmem [resolvable:$true] %s1065_s8 }
 0x2ec   : > { %s1730_s21 = scalar_lea.vmem %s2281_s8, 1024  ;;  %p2400_p3 = scmp.ne.s32.totalorder %s2387_s11, 0 }
 0x2ed   : > { %p1731_p1 = scmp.ne.s32.totalorder %s2281_s8, %s1730_s21  ;;  %s1865_s4 = smov [#allocation9]  }
 0x2ee   : > { %s1734_s24 = sshll.u32 %s1865_s4, 4  ;;  %s1735_s24 = int_to_ptr.vmem [resolvable:$false] %s1734_s24 }
 0x2ef   : > { %p1732_p2 = pnand %p1731_p1, %p2400_p3  ;;  %s1736_s19 = scalar_lea.vmem %s1735_s24, 2048 }
 0x2f0   : > { %s2278_s9 = scalar_lea.hbm %s2399_s25, %s1298_s18  ;;  %p1737_p0 = scmp.lt.s32.totalorder %s2281_s8, %s1735_s24 }
 0x2f1   : > { %p1733_p12 = pneg %p1732_p2  ;;  %p1738_p7 = scmp.lt.s32.totalorder %s1736_s19, %s1730_s21 }
 0x2f3   : > { %p1739_p8 = por %p1738_p7, %p1737_p0 }
 0x2f5   : > { %p1740_p4 = pnand %p1739_p8, %p1733_p12 }
 0x2f7   : > { %1743 = shalt.err (!%p1740_p4)
}
 0x2f8   : > { %s1744_s14 = scalar_lea.hbm %s2278_s9, 1024  ;;  %s1748_s26 = scalar_lea.hbm %s2399_s25, 2048 }
 0x2f9   : > { %p1745_p5 = scmp.ne.s32.totalorder %s2278_s9, %s1744_s14  ;;  %p1749_p9 = scmp.lt.u32.totalorder %s2278_s9, %s2399_s25 }
 0x2fa   : > { %p1750_p6 = scmp.lt.u32.totalorder %s1748_s26, %s1744_s14  ;;  %p1752_p1 = scmp.lt.u32.totalorder %s1744_s14, %s2278_s9 }
 0x2fb   : > { %p1746_p11 = pnand %p1745_p5, %p2400_p3 }
 0x2fc   : > { %p1751_p13 = por %p1750_p6, %p1749_p9 }
 0x2fd   : > { %p1747_p10 = pneg %p1746_p11 }
 0x2fe   : > { %p1753_p2 = por %p1752_p1, %p1751_p13 }
 0x300   : > { %p1754_p12 = pnand %p1753_p2, %p1747_p10 }
 0x302   : > { %1757 = shalt.err (!%p1754_p12)
}
 0x303   : > { %s1866_s10 = smov 64   ;;  %s1867_s30 = smov 4  }
 0x304   : > { %1432 = dma.vmem_to_hbm [thread:$0]  (%p2400_p3), %s2281_s8, 1024, %s2278_s9, %s1052_s3, %s1866_s10, %s1866_s10, %s1867_s30  }
 0x305 PF: > { %s2401_s29 = sld [smem:[#allocation14_spill]]  ;;  %p1449_p0 = scmp.ge.s32.totalorder %s1856_s22, 2 }
 0x306   : > { %p2402_p7 = scmp.ne.s32.totalorder %s2388_s6, 0 }
 0x308   : > { %p1445_p8 = pnand %p1449_p0, %p2402_p7 }
 0x30b   : > { %s1080_s20 = sand.u32 1, %s2401_s29  }
 0x30c   : > { %s1081_s7 = scalar_lea.sflag [#allocation5], %s1080_s20 }
 0x30d   : > { %1811 = dma.done.wait (!%p1445_p8), %s1081_s7, 1024  }
 0x30e   : > { %1813 = vsyncadd (!%p1445_p8), %s1081_s7, 4294966272  ;;  %s22_s22 = sadd.s32 1, %s1856_s22   ;;  %s2403_s5 = sld [smem:[#allocation13_spill]] }
 0x30f   : > { %p19_p4 = scmp.ge.s32.totalorder %s22_s22, 6   ;;  %s2404_s14 = sld [smem:[#allocation19_spill]] }
 0x310   : > { %s2405_s11 = sld [smem:[#allocation15_spill]]  ;;  %s2406_s17 = sld [smem:[#allocation21_spill]] }
 0x311   : > { %s2407_s18 = sld [smem:[#allocation16_spill]]  ;;  %s2408_s19 = sld [smem:[#allocation17_spill]] }
 0x312   : > { %s2409_s20 = sld [smem:[#allocation18_spill]]  ;;  %s2410_s21 = sld [smem:[#allocation20_spill]] }
 0x313   : > { %s2411_s12 = smov %s1820_s13  ;;  %s2413_s15 = smov %s1832_s16 }
 0x314   : > { %s2412_s13 = smov %s2403_s5  ;;  %21 = sbr.rel (!%p19_p4) target bundleno = 14 (0xe), region = 109 }
 0x316   : > { %s2414_s16 = smov %s2405_s11 }
 0x31b   :  { %1086 = vsyncpa [#allocation4], 1 }
 0x31c   :  { %1088 = vsyncpa [#allocation4 + $0x1], 1 }
 0x31d   :  { %1089 = vsyncpa [#allocation7], 1 }
 0x31e   :  { %1091 = vsyncpa [#allocation7 + $0x1], 1 }
 0x31f   :  { %1092 = vsyncpa [#allocation5], 1 }
 0x320   :  { %1094 = vsyncpa [#allocation5 + $0x1], 1 }

</bundles_post_ra>
